<compile_context>
chip_gen: v7x
topology: tpu7x:2x2x1
jax: 0.10.0
libtpu: 0.0.40
codegen_flags: <defaults>
</compile_context>

<pallas_src>
import jax
import jax.numpy as jnp
from jax.experimental import pallas as pl
from jax.experimental.pallas import tpu as pltpu


def _round_up(v, m):
    return (v + m - 1) // m * m


def graph_gnn_kernel(a_ref, x_ref, w1_ref, b1_ref, w2_ref, b2_ref,
                     pa_ref, psum_ref, wh_ref, bh_ref, out_ref, acc_ref):
    i = pl.program_id(0)

    @pl.when(i == 0)
    def _init():
        acc_ref[...] = jnp.zeros_like(acc_ref)

    # GCN layer 1 on this row-tile of A_hat:  H1 = ReLU(A_tile @ (X @ W1) + b1)
    # bf16 MXU operands, f32 accumulation.
    xw1 = jnp.dot(x_ref[...], w1_ref[...],
                  preferred_element_type=jnp.float32)                 # [n_pad, c_hidden]
    h1 = jnp.dot(a_ref[...], xw1.astype(jnp.bfloat16),
                 preferred_element_type=jnp.float32) + b1_ref[...]    # [TM, c_hidden]
    h1 = jnp.maximum(h1, 0.0)                                         # dropout: eval no-op

    # GCN layer 2 folded into mean pooling (PA = P @ A_hat precomputed):
    #   pooled += PA[:, tile] @ (H1_tile @ W2)
    h1w2 = jnp.dot(h1.astype(jnp.bfloat16), w2_ref[...],
                   preferred_element_type=jnp.float32)                # [TM, c_hidden]
    acc_ref[...] += jnp.dot(pa_ref[...], h1w2.astype(jnp.bfloat16),
                            preferred_element_type=jnp.float32)       # [b_pad, c_hidden]

    @pl.when(i == pl.num_programs(0) - 1)
    def _finalize():
        # P @ b2 == rowsum(P) * b2  (exactly 0 for empty / padded graphs).
        pooled = acc_ref[...] + psum_ref[...] * b2_ref[...]
        out_ref[...] = (jnp.dot(pooled, wh_ref[...],
                                preferred_element_type=jnp.float32)
                        + bh_ref[...]).astype(out_ref.dtype)


def graph_gnn_forward(x, edge_index, batch_idx, params, num_graphs, tile_rows=128):
    """Builds dense A_hat / PA once per batch, then runs the tiled fused kernel."""
    n, c_in = x.shape
    w1, b1, w2, b2, wh, bh = params
    c_hidden = w1.shape[1]
    c_out = wh.shape[1]

    assert tile_rows % 128 == 0, "tile_rows must be a multiple of 128"
    n_pad = _round_up(max(n, tile_rows), tile_rows)
    b_pad = _round_up(max(num_graphs, 8), 8)
    c_out_pad = _round_up(c_out, 128)               # lane-dense head / output stores

    # Dense adjacency with self loops + GCN symmetric normalization (padded).
    adj = jnp.zeros((n_pad, n_pad), jnp.float32)
    adj = adj.at[edge_index[0], edge_index[1]].add(1.0)
    adj = adj + jnp.eye(n_pad, dtype=jnp.float32)
    deg = adj.sum(axis=1)
    d_inv_sqrt = jnp.where(deg > 0, jax.lax.rsqrt(deg), 0.0)
    a_hat = adj * d_inv_sqrt[:, None] * d_inv_sqrt[None, :]

    # Mean-pool matrix P and the folded propagation PA = P @ A_hat.
    if n_pad > n:
        bidx = jnp.concatenate([batch_idx.astype(jnp.int32),
                                jnp.full((n_pad - n,), -1, jnp.int32)])
    else:
        bidx = batch_idx.astype(jnp.int32)
    onehot = (bidx[None, :] == jnp.arange(b_pad, dtype=jnp.int32)[:, None]).astype(jnp.float32)
    counts = onehot.sum(axis=1, keepdims=True)
    p = onehot / jnp.maximum(counts, 1.0)                       # [b_pad, n_pad]
    pa = jnp.dot(p, a_hat)                                      # [b_pad, n_pad]
    psum = p.sum(axis=1, keepdims=True)                         # rowsum(P): 1 or 0

    # Pad features and head to lane-friendly shapes.
    x_pad = jnp.zeros((n_pad, c_in), jnp.float32).at[:n].set(x.astype(jnp.float32))
    wh_pad = jnp.zeros((c_hidden, c_out_pad), jnp.float32).at[:, :c_out].set(wh)
    bh_pad = jnp.zeros((1, c_out_pad), jnp.float32).at[:, :c_out].set(bh)

    # bf16 for the streaming / MXU operands; f32 accumulation inside the kernel.
    a_bf16 = a_hat.astype(jnp.bfloat16)
    pa_bf16 = pa.astype(jnp.bfloat16)
    x_bf16 = x_pad.astype(jnp.bfloat16)
    w1_bf16 = w1.astype(jnp.bfloat16)
    w2_bf16 = w2.astype(jnp.bfloat16)

    grid = (n_pad // tile_rows,)

    out = pl.pallas_call(
        graph_gnn_kernel,
        out_shape=jax.ShapeDtypeStruct((b_pad, c_out_pad), jnp.float32),
        grid_spec=pltpu.PrefetchScalarGridSpec(
            num_scalar_prefetch=0,
            grid=grid,
            in_specs=[
                pl.BlockSpec((tile_rows, n_pad), lambda i: (i, 0)),     # A_hat row tile (streamed)
                pl.BlockSpec((n_pad, c_in), lambda i: (0, 0)),          # X (resident)
                pl.BlockSpec((c_in, c_hidden), lambda i: (0, 0)),       # W1
                pl.BlockSpec((1, c_hidden), lambda i: (0, 0)),          # b1
                pl.BlockSpec((c_hidden, c_hidden), lambda i: (0, 0)),   # W2
                pl.BlockSpec((1, c_hidden), lambda i: (0, 0)),          # b2
                pl.BlockSpec((b_pad, tile_rows), lambda i: (0, i)),     # PA column tile
                pl.BlockSpec((b_pad, 1), lambda i: (0, 0)),             # rowsum(P)
                pl.BlockSpec((c_hidden, c_out_pad), lambda i: (0, 0)),  # W_head (lane-padded)
                pl.BlockSpec((1, c_out_pad), lambda i: (0, 0)),         # b_head (lane-padded)
            ],
            out_specs=pl.BlockSpec((b_pad, c_out_pad), lambda i: (0, 0)),
            scratch_shapes=[pltpu.VMEM((b_pad, c_hidden), jnp.float32)],
        ),
        compiler_params=pltpu.CompilerParams(
            # The row-tile axis is also the pooled-reduction axis (accumulator).
            dimension_semantics=("arbitrary",),
            vmem_limit_bytes=48 * 1024 * 1024,
        ),
    )(a_bf16, x_bf16, w1_bf16, b1, w2_bf16, b2, pa_bf16, psum, wh_pad, bh_pad)

    return out[:num_graphs, :c_out]


def reference_forward(x, edge_index, batch_idx, params, num_graphs):
    """Pure-JAX f32 reference faithful to eval-mode GraphGNNModel."""
    n = x.shape[0]
    w1, b1, w2, b2, wh, bh = params
    adj = jnp.zeros((n, n), jnp.float32).at[edge_index[0], edge_index[1]].add(1.0)
    adj = adj + jnp.eye(n, dtype=jnp.float32)
    deg = adj.sum(axis=1)
    d_inv_sqrt = jnp.where(deg > 0, jax.lax.rsqrt(deg), 0.0)
    a_hat = adj * d_inv_sqrt[:, None] * d_inv_sqrt[None, :]
    h = jnp.maximum(a_hat @ (x @ w1) + b1, 0.0)
    h = a_hat @ (h @ w2) + b2
    onehot = (batch_idx[None, :] == jnp.arange(num_graphs)[:, None]).astype(jnp.float32)
    pooled = (onehot @ h) / jnp.maximum(onehot.sum(axis=1, keepdims=True), 1.0)
    return pooled @ wh + bh


def init_params(key, c_in, c_hidden, c_out):
    """Deterministic Glorot-uniform weights, small uniform biases."""
    def glorot(k, fan_in, fan_out):
        lim = jnp.sqrt(6.0 / (fan_in + fan_out))
        return jax.random.uniform(k, (fan_in, fan_out), jnp.float32, -lim, lim)

    k1, k2, k3, k4, k5, k6 = jax.random.split(key, 6)
    w1 = glorot(k1, c_in, c_hidden)
    b1 = jax.random.uniform(k4, (1, c_hidden), jnp.float32, -0.1, 0.1)
    w2 = glorot(k2, c_hidden, c_hidden)          # GNN c_out == c_hidden
    b2 = jax.random.uniform(k5, (1, c_hidden), jnp.float32, -0.1, 0.1)
    wh = glorot(k3, c_hidden, c_out)
    bh = jax.random.uniform(k6, (1, c_out), jnp.float32, -0.1, 0.1)
    return (w1, b1, w2, b2, wh, bh)


if __name__ == "__main__":
    key = jax.random.PRNGKey(0)
    k_x, k_p = jax.random.split(key)

    C_IN, C_HIDDEN, C_OUT, N_GRAPHS = 4, 32, 2, 2
    SIZES = (72, 88)            # two ring graphs -> N=160 nodes, 2 row tiles of 128
    N = sum(SIZES)

    # Undirected ring graphs in PyG edge_index [2, E] convention.
    srcs, dsts, bidx = [], [], []
    start = 0
    for g, sz in enumerate(SIZES):
        idx = jnp.arange(sz, dtype=jnp.int32)
        nxt = (idx + 1) % sz
        srcs += [idx + start, nxt + start]
        dsts += [nxt + start, idx + start]
        bidx.append(jnp.full((sz,), g, jnp.int32))
        start += sz
    edge_index = jnp.stack([jnp.concatenate(srcs), jnp.concatenate(dsts)], axis=0)
    batch_idx = jnp.concatenate(bidx)

    x = jax.random.normal(k_x, (N, C_IN), dtype=jnp.float32)
    params = init_params(k_p, C_IN, C_HIDDEN, C_OUT)

    fwd = jax.jit(graph_gnn_forward, static_argnames=("num_graphs", "tile_rows"))
    out = jax.block_until_ready(fwd(x, edge_index, batch_idx, params,
                                    num_graphs=N_GRAPHS, tile_rows=128))
    assert out.shape == (N_GRAPHS, C_OUT)
    assert bool(jnp.all(jnp.isfinite(out)))

    ref = reference_forward(x, edge_index, batch_idx, params, N_GRAPHS)
    assert bool(jnp.allclose(out, ref, atol=5e-2, rtol=5e-2)), (out, ref)
    print("KERNEL_OK")
</pallas_src>

<mosaic_0001>
module attributes {stable_mosaic.version = 11 : i64} {
  func.func private @main(%arg0: i32) attributes {dimension_semantics = [#tpu.dimension_semantics<core_parallel>], iteration_bounds = array<i64: 2>, tpu.core_type = #tpu.core_type<sc_scalar_subcore>, window_params = []} {
    return
  }
}

module attributes {stable_mosaic.version = 11 : i64} {
  func.func private @main(%arg0: i32) attributes {dimension_semantics = [#tpu.dimension_semantics<core_parallel>], iteration_bounds = array<i64: 2>, tpu.core_type = #tpu.core_type<sc_scalar_subcore>, window_params = []} {
    return
  }
}

module attributes {stable_mosaic.version = 11 : i64} {
  func.func @graph_gnn_kernel(%arg0: i32, %arg1: memref<128x256xbf16, #tpu.memory_space<vmem>>, %arg2: memref<256x4xbf16, #tpu.memory_space<vmem>>, %arg3: memref<4x32xbf16, #tpu.memory_space<vmem>>, %arg4: memref<1x32xf32, #tpu.memory_space<vmem>>, %arg5: memref<32x32xbf16, #tpu.memory_space<vmem>>, %arg6: memref<1x32xf32, #tpu.memory_space<vmem>>, %arg7: memref<8x128xbf16, #tpu.memory_space<vmem>>, %arg8: memref<8x1xf32, #tpu.memory_space<vmem>>, %arg9: memref<32x128xf32, #tpu.memory_space<vmem>>, %arg10: memref<1x128xf32, #tpu.memory_space<vmem>>, %arg11: memref<8x128xf32, #tpu.memory_space<vmem>>, %arg12: memref<8x32xf32, #tpu.memory_space<vmem>>) attributes {dimension_semantics = [#tpu.dimension_semantics<arbitrary>], iteration_bounds = array<i64: 2>, scalar_prefetch = 0 : i64, scratch_operands = 1 : i64, tpu.core_type = #tpu.core_type<tc>, window_params = [{transform_indices = @transform_0, window_bounds = array<i64: 128, 256>}, {pipeline_mode = #tpu.pipeline_mode<synchronous>, transform_indices = @transform_1, window_bounds = array<i64: 256, 4>}, {pipeline_mode = #tpu.pipeline_mode<synchronous>, transform_indices = @transform_2, window_bounds = array<i64: 4, 32>}, {pipeline_mode = #tpu.pipeline_mode<synchronous>, transform_indices = @transform_3, window_bounds = array<i64: 1, 32>}, {pipeline_mode = #tpu.pipeline_mode<synchronous>, transform_indices = @transform_4, window_bounds = array<i64: 32, 32>}, {pipeline_mode = #tpu.pipeline_mode<synchronous>, transform_indices = @transform_5, window_bounds = array<i64: 1, 32>}, {transform_indices = @transform_6, window_bounds = array<i64: 8, 128>}, {pipeline_mode = #tpu.pipeline_mode<synchronous>, transform_indices = @transform_7, window_bounds = array<i64: 8, 1>}, {pipeline_mode = #tpu.pipeline_mode<synchronous>, transform_indices = @transform_8, window_bounds = array<i64: 32, 128>}, {pipeline_mode = #tpu.pipeline_mode<synchronous>, transform_indices = @transform_9, window_bounds = array<i64: 1, 128>}, {pipeline_mode = #tpu.pipeline_mode<synchronous>, transform_indices = @transform_10, window_bounds = array<i64: 8, 128>}]} {
    %c0_i32 = arith.constant 0 : i32
    %0 = arith.cmpi eq, %arg0, %c0_i32 : i32
    %1 = arith.extui %0 : i1 to i32
    %c0_i32_0 = arith.constant 0 : i32
    %2 = arith.cmpi ne, %1, %c0_i32_0 : i32
    scf.if %2 {
      %cst_21 = arith.constant 0.000000e+00 : f32
      %26 = vector.broadcast %cst_21 : f32 to vector<8x32xf32>
      %c0_22 = arith.constant 0 : index
      %c0_23 = arith.constant 0 : index
      %27 = vector.load %arg12[%c0_22, %c0_23] : memref<8x32xf32, #tpu.memory_space<vmem>>, vector<8x32xf32>
      tpu.vector_store %arg12[%c0_22, %c0_23], %26 {strides = array<i32>} : memref<8x32xf32, #tpu.memory_space<vmem>>, vector<8x32xf32>,
    } else {
    }
    %c0 = arith.constant 0 : index
    %c0_1 = arith.constant 0 : index
    %3 = vector.load %arg2[%c0, %c0_1] : memref<256x4xbf16, #tpu.memory_space<vmem>>, vector<256x4xbf16>
    %c0_2 = arith.constant 0 : index
    %c0_3 = arith.constant 0 : index
    %4 = vector.load %arg3[%c0_2, %c0_3] : memref<4x32xbf16, #tpu.memory_space<vmem>>, vector<4x32xbf16>
    %cst = arith.constant dense<0.000000e+00> : vector<256x32xf32>
    %5 = tpu.matmul %3, %4, %cst {dimension_numbers = #tpu.dot_dimension_numbers<[1], [0], [0], [1], [0, 0, 1, 1], [], []>} : vector<256x4xbf16>, vector<4x32xbf16>, vector<256x32xf32> -> vector<256x32xf32>
    %c0_4 = arith.constant 0 : index
    %c0_5 = arith.constant 0 : index
    %6 = vector.load %arg1[%c0_4, %c0_5] : memref<128x256xbf16, #tpu.memory_space<vmem>>, vector<128x256xbf16>
    %7 = arith.truncf %5 : vector<256x32xf32> to vector<256x32xbf16>
    %cst_6 = arith.constant dense<0.000000e+00> : vector<128x32xf32>
    %8 = tpu.matmul %6, %7, %cst_6 {dimension_numbers = #tpu.dot_dimension_numbers<[1], [0], [0], [1], [0, 0, 1, 1], [], []>} : vector<128x256xbf16>, vector<256x32xbf16>, vector<128x32xf32> -> vector<128x32xf32>
    %c0_7 = arith.constant 0 : index
    %c0_8 = arith.constant 0 : index
    %9 = vector.load %arg4[%c0_7, %c0_8] : memref<1x32xf32, #tpu.memory_space<vmem>>, vector<1x32xf32>
    %10 = vector.broadcast %9 : vector<1x32xf32> to vector<128x32xf32>
    %11 = arith.addf %8, %10 : vector<128x32xf32>
    %cst_9 = arith.constant 0.000000e+00 : f32
    %12 = vector.broadcast %cst_9 : f32 to vector<128x32xf32>
    %13 = arith.maximumf %11, %12 : vector<128x32xf32>
    %14 = arith.truncf %13 : vector<128x32xf32> to vector<128x32xbf16>
    %c0_10 = arith.constant 0 : index
    %c0_11 = arith.constant 0 : index
    %15 = vector.load %arg5[%c0_10, %c0_11] : memref<32x32xbf16, #tpu.memory_space<vmem>>, vector<32x32xbf16>
    %cst_12 = arith.constant dense<0.000000e+00> : vector<128x32xf32>
    %16 = tpu.matmul %14, %15, %cst_12 {dimension_numbers = #tpu.dot_dimension_numbers<[1], [0], [0], [1], [0, 0, 1, 1], [], []>} : vector<128x32xbf16>, vector<32x32xbf16>, vector<128x32xf32> -> vector<128x32xf32>
    %c0_13 = arith.constant 0 : index
    %c0_14 = arith.constant 0 : index
    %17 = vector.load %arg12[%c0_13, %c0_14] : memref<8x32xf32, #tpu.memory_space<vmem>>, vector<8x32xf32>
    %c0_15 = arith.constant 0 : index
    %c0_16 = arith.constant 0 : index
    %18 = vector.load %arg7[%c0_15, %c0_16] : memref<8x128xbf16, #tpu.memory_space<vmem>>, vector<8x128xbf16>
    %19 = arith.truncf %16 : vector<128x32xf32> to vector<128x32xbf16>
    %cst_17 = arith.constant dense<0.000000e+00> : vector<8x32xf32>
    %20 = tpu.matmul %18, %19, %cst_17 {dimension_numbers = #tpu.dot_dimension_numbers<[1], [0], [0], [1], [0, 0, 1, 1], [], []>} : vector<8x128xbf16>, vector<128x32xbf16>, vector<8x32xf32> -> vector<8x32xf32>
    %21 = arith.addf %17, %20 : vector<8x32xf32>
    %c0_18 = arith.constant 0 : index
    %c0_19 = arith.constant 0 : index
    %22 = vector.load %arg12[%c0_18, %c0_19] : memref<8x32xf32, #tpu.memory_space<vmem>>, vector<8x32xf32>
    tpu.vector_store %arg12[%c0_18, %c0_19], %21 {strides = array<i32>} : memref<8x32xf32, #tpu.memory_space<vmem>>, vector<8x32xf32>,
    %c1_i32 = arith.constant 1 : i32
    %23 = arith.cmpi eq, %arg0, %c1_i32 : i32
    %24 = arith.extui %23 : i1 to i32
    %c0_i32_20 = arith.constant 0 : i32
    %25 = arith.cmpi ne, %24, %c0_i32_20 : i32
    scf.if %25 {
      %c0_21 = arith.constant 0 : index
      %c0_22 = arith.constant 0 : index
      %26 = vector.load %arg12[%c0_21, %c0_22] : memref<8x32xf32, #tpu.memory_space<vmem>>, vector<8x32xf32>
      %c0_23 = arith.constant 0 : index
      %c0_24 = arith.constant 0 : index
      %27 = vector.load %arg8[%c0_23, %c0_24] : memref<8x1xf32, #tpu.memory_space<vmem>>, vector<8x1xf32>
      %c0_25 = arith.constant 0 : index
      %c0_26 = arith.constant 0 : index
      %28 = vector.load %arg6[%c0_25, %c0_26] : memref<1x32xf32, #tpu.memory_space<vmem>>, vector<1x32xf32>
      %29 = vector.broadcast %27 : vector<8x1xf32> to vector<8x32xf32>
      %30 = vector.broadcast %28 : vector<1x32xf32> to vector<8x32xf32>
      %31 = arith.mulf %29, %30 : vector<8x32xf32>
      %32 = arith.addf %26, %31 : vector<8x32xf32>
      %c0_27 = arith.constant 0 : index
      %c0_28 = arith.constant 0 : index
      %33 = vector.load %arg9[%c0_27, %c0_28] : memref<32x128xf32, #tpu.memory_space<vmem>>, vector<32x128xf32>
      %cst_29 = arith.constant dense<0.000000e+00> : vector<8x128xf32>
      %34 = tpu.matmul %32, %33, %cst_29 {dimension_numbers = #tpu.dot_dimension_numbers<[1], [0], [0], [1], [0, 0, 1, 1], [], []>} : vector<8x32xf32>, vector<32x128xf32>, vector<8x128xf32> -> vector<8x128xf32>
      %c0_30 = arith.constant 0 : index
      %c0_31 = arith.constant 0 : index
      %35 = vector.load %arg10[%c0_30, %c0_31] : memref<1x128xf32, #tpu.memory_space<vmem>>, vector<1x128xf32>
      %36 = vector.broadcast %35 : vector<1x128xf32> to vector<8x128xf32>
      %37 = arith.addf %34, %36 : vector<8x128xf32>
      %c0_32 = arith.constant 0 : index
      %c0_33 = arith.constant 0 : index
      %38 = vector.load %arg11[%c0_32, %c0_33] : memref<8x128xf32, #tpu.memory_space<vmem>>, vector<8x128xf32>
      tpu.vector_store %arg11[%c0_32, %c0_33], %37 {strides = array<i32>} : memref<8x128xf32, #tpu.memory_space<vmem>>, vector<8x128xf32>,
    } else {
    }
    return
  }
  func.func @transform_0(%arg0: i32) -> (i32, i32) {
    %c0_i32 = arith.constant 0 : i32
    %c0_i32_0 = arith.constant 0 : i32
    return %arg0, %c0_i32 : i32, i32
  }
  func.func @transform_1(%arg0: i32) -> (i32, i32) {
    %c0_i32 = arith.constant 0 : i32
    %c0_i32_0 = arith.constant 0 : i32
    %c0_i32_1 = arith.constant 0 : i32
    return %c0_i32, %c0_i32_0 : i32, i32
  }
  func.func @transform_2(%arg0: i32) -> (i32, i32) {
    %c0_i32 = arith.constant 0 : i32
    %c0_i32_0 = arith.constant 0 : i32
    %c0_i32_1 = arith.constant 0 : i32
    return %c0_i32, %c0_i32_0 : i32, i32
  }
  func.func @transform_3(%arg0: i32) -> (i32, i32) {
    %c0_i32 = arith.constant 0 : i32
    %c0_i32_0 = arith.constant 0 : i32
    %c0_i32_1 = arith.constant 0 : i32
    return %c0_i32, %c0_i32_0 : i32, i32
  }
  func.func @transform_4(%arg0: i32) -> (i32, i32) {
    %c0_i32 = arith.constant 0 : i32
    %c0_i32_0 = arith.constant 0 : i32
    %c0_i32_1 = arith.constant 0 : i32
    return %c0_i32, %c0_i32_0 : i32, i32
  }
  func.func @transform_5(%arg0: i32) -> (i32, i32) {
    %c0_i32 = arith.constant 0 : i32
    %c0_i32_0 = arith.constant 0 : i32
    %c0_i32_1 = arith.constant 0 : i32
    return %c0_i32, %c0_i32_0 : i32, i32
  }
  func.func @transform_6(%arg0: i32) -> (i32, i32) {
    %c0_i32 = arith.constant 0 : i32
    %c0_i32_0 = arith.constant 0 : i32
    return %c0_i32, %arg0 : i32, i32
  }
  func.func @transform_7(%arg0: i32) -> (i32, i32) {
    %c0_i32 = arith.constant 0 : i32
    %c0_i32_0 = arith.constant 0 : i32
    %c0_i32_1 = arith.constant 0 : i32
    return %c0_i32, %c0_i32_0 : i32, i32
  }
  func.func @transform_8(%arg0: i32) -> (i32, i32) {
    %c0_i32 = arith.constant 0 : i32
    %c0_i32_0 = arith.constant 0 : i32
    %c0_i32_1 = arith.constant 0 : i32
    return %c0_i32, %c0_i32_0 : i32, i32
  }
  func.func @transform_9(%arg0: i32) -> (i32, i32) {
    %c0_i32 = arith.constant 0 : i32
    %c0_i32_0 = arith.constant 0 : i32
    %c0_i32_1 = arith.constant 0 : i32
    return %c0_i32, %c0_i32_0 : i32, i32
  }
  func.func @transform_10(%arg0: i32) -> (i32, i32) {
    %c0_i32 = arith.constant 0 : i32
    %c0_i32_0 = arith.constant 0 : i32
    %c0_i32_1 = arith.constant 0 : i32
    return %c0_i32, %c0_i32_0 : i32, i32
  }
}

</mosaic_0001>

<bundles_post_ra>
// kernel: graph_gnn_forward.1
= control target key start
LH: loop header
LB: loop body
LE: loop exit
PB: predicated region body
PF: predicated region fallthrough
CT: control target
= control target key end

     0   :  { %s1676_s13 = smov 0   ;;  %s1849_s0 = inlined_call_operand.vmem [shape: bf16[256,256], index: 0, kind: input, shape index: {}]   ;;  %s1850_s1 = inlined_call_operand.vmem [shape: bf16[256,4], index: 1, kind: input, shape index: {}]   ;;  %s1851_s2 = inlined_call_operand.vmem [shape: bf16[4,32], index: 2, kind: input, shape index: {}]   ;;  %s1852_s3 = inlined_call_operand.vmem [shape: f32[1,32], index: 3, kind: input, shape index: {}]   ;;  %s1853_s4 = inlined_call_operand.vmem [shape: bf16[32,32], index: 4, kind: input, shape index: {}]   ;;  %s1854_s5 = inlined_call_operand.vmem [shape: f32[1,32], index: 5, kind: input, shape index: {}]   ;;  %s1855_s6 = inlined_call_operand.vmem [shape: bf16[8,256], index: 6, kind: input, shape index: {}]   ;;  %s1856_s7 = inlined_call_operand.vmem [shape: f32[8,1], index: 7, kind: input, shape index: {}]   ;;  %s1857_s8 = inlined_call_operand.vmem [shape: f32[32,128], index: 8, kind: input, shape index: {}]   ;;  %s1858_s9 = inlined_call_operand.vmem [shape: f32[1,128], index: 9, kind: input, shape index: {}]   ;;  %s1859_s10 = inlined_call_operand.vmem [shape: f32[8,128], index: 10, kind: output, shape index: {}]  }
   0x1 LB: > { %s1682_s14 = sadd.s32 4294967295, %s1612_s13   ;;  %p1279_p0 = scmp.ge.s32.totalorder %s1612_s13, 1  ;;  %s1612_s13 = sphi %s1676_s13, %s20_s13  }
   0x2   : > { %p318_p1 = scmp.lt.s32.totalorder %s1612_s13, 3 }
   0x4   : > { %p319_p2 = pnand %p1279_p0, %p318_p1 }
   0x5   : > { %s1280_s15 = sshll.u32 (!%p319_p2), %s1682_s14, 4  ;;  %p363_p3 = scmp.lt.s32.totalorder (!%p319_p2), %s1682_s14, 1 }
   0x6   : > { %322 = sbr.rel (%p319_p2) target bundleno = 1249 (0x4e1), region = 60  ;;  %p357_p4 = scmp.lt.s32.totalorder (!%p319_p2), %s1280_s15, 31 }
   0x7   : > { %p1284_p5 = scmp.ne.s32.totalorder (!%p319_p2), %s1682_s14, 0 }
   0xd   : > { %s364_s16 = scalar_select %p363_p3, %s1682_s14, 1 }
   0xe   : > { %s1861_s15 = smov (!%p357_p4, %s1280_s15), 31  ;;  %371 = sbr.rel (%p1284_p5) target bundleno = 21 (0x15), region = 64 }
   0xf   : > { %s1283_s17 = sshll.u32 %s364_s16, 2  ;;  %s1350_s18 = sshll.u32 %s1861_s15, 3  ;;  %vm372_vm0 = vcmask (!%p1284_p5), 261120   ;;  %v1614_v0 = vmov (!%p1284_p5), 0.0  }
  0x10   : > { %s1692_s21 = scalar_lea.vmem %s1855_s6, %s1283_s17  ;;  %s1697_s24 = scalar_lea.vmem %s1849_s0, %s1350_s18  ;;  %373 = vst.msk [vmem:[#allocation2] sm:$0xff] (!%p1284_p5), %vm372_vm0, %v1614_v0 }
  0x15 PF: > { %v406_v1 = vld [vmem:[%s1851_s2] sm:$0x3]  ;;  %vm536_vm1 = vcmask 1041408   ;;  %vm487_vm2 = vcmask 31744   ;;  %v1564_v4 = vld [vmem:[%s1850_s1 + $0x8] sm:$0xff]   ;;  %v1565_v5 = vld [vmem:[%s1850_s1 + $0x10] sm:$0xff]  }
  0x16   : > { %v1563_v2 = vld [vmem:[%s1850_s1] sm:$0xff]   ;;  %1547 = vmatprep.subr.msk.bf16.mxu0 %vm536_vm1, %v406_v1  ;;  %v538_v3 = vsel %vm536_vm1, %v406_v1, 0  ;;  %v1566_v6 = vld [vmem:[%s1850_s1 + $0x18] sm:$0xff]   ;;  %v1568_v8 = vld [vmem:[%s1850_s1 + $0x28] sm:$0xff]   ;;  %vm957_vm3 = vcmask 261120   ;;  %vm1616_vm4 = vmmov 0  }
  0x17   : > { %1457 = vmatpush3.bf16.msra.mxu0 %v538_v3  ;;  %1458 = vmatprep.mubr.msk.bf16.mxu0 %vm487_vm2, %v1563_v2  ;;  %v1567_v7 = vld [vmem:[%s1850_s1 + $0x20] sm:$0xff]   ;;  %v1569_v9 = vld [vmem:[%s1850_s1 + $0x30] sm:$0xff]   ;;  %v1570_v10 = vld [vmem:[%s1850_s1 + $0x38] sm:$0xff]   ;;  %p1344_p6 = scmp.ne.s32.totalorder %s1682_s14, 1 }
  0x18   : > { %v1571_v11 = vld [vmem:[%s1850_s1 + $0x40] sm:$0xff]   ;;  %v1572_v12 = vld [vmem:[%s1850_s1 + $0x48] sm:$0xff]   ;;  %v1573_v13 = vld [vmem:[%s1850_s1 + $0x50] sm:$0xff]   ;;  %vm1619_vm5 = vmmov (!%p1344_p6), 0  }
  0x19   : > { %v1574_v14 = vld [vmem:[%s1850_s1 + $0x58] sm:$0xff]   ;;  %v1575_v15 = vld [vmem:[%s1850_s1 + $0x60] sm:$0xff]   ;;  %v1576_v16 = vld [vmem:[%s1850_s1 + $0x68] sm:$0xff]  }
  0x1a   : > { %1459 = vmatmul.mubr.msk.bf16.vlgmr.msra.gmra.mrb[0].mxu0 %vm487_vm2, %v1564_v4  ;;  %v1577_v17 = vld [vmem:[%s1850_s1 + $0x70] sm:$0xff]   ;;  %v1578_v18 = vld [vmem:[%s1850_s1 + $0x78] sm:$0xff]   ;;  %v1581_v19 = vld [vmem:[%s1697_s24 + $0x4] ss:$8 sps:$4 sm:$0xff]  }
  0x1b   : > { %1462 = vmatprep.mubr.msk.bf16.mxu0 %vm487_vm2, %v1565_v5  ;;  %852 = vmatprep.mubr.bf16.mxu1 %v1581_v19  ;;  %v1603_v20 = vld [vmem:[%s1853_s4] sm:$0xff]   ;;  %v1602_v19 = vld [vmem:[%s1697_s24 + $0x70] ss:$8 sps:$4 sm:$0xff]  }
  0x1c   : > { %1490 = vmatprep.subr.bf16.mxu0 %v1603_v20  ;;  %v1579_v5 = vld [vmem:[%s1697_s24] ss:$8 sps:$4 sm:$0xff]  }
  0x1d   : > { %1491 = vmatpush3.bf16.msra.mxu0 %v1603_v20  ;;  %v1604_v20 = vld [vmem:[%s1853_s4 + $0x8] sm:$0xff]  }
  0x1e   : > { %1492 = vmatprep.subr.bf16.mxu0 %v1604_v20 }
  0x21   : > { %1493 = vmatpush3.bf16.msra.mxu0 %v1604_v20 }
  0x22   : > { %1463 = vmatmul.mubr.msk.bf16.gmra.mrb[4].mxu0 %vm487_vm2, %v1566_v6  ;;  %v1582_v6 = vld [vmem:[%s1697_s24 + $0x14] ss:$8 sps:$4 sm:$0xff]  }
  0x23   : > { %1466 = vmatprep.mubr.msk.bf16.mxu0 %vm487_vm2, %v1567_v7  ;;  %v1584_v7 = vld [vmem:[%s1697_s24 + $0x10] ss:$8 sps:$4 sm:$0xff]  }
  0x2a   : > { %1467 = vmatmul.mubr.msk.bf16.gmra.mrb[8].mxu0 %vm487_vm2, %v1568_v8  ;;  %v1585_v8 = vld [vmem:[%s1697_s24 + $0x24] ss:$8 sps:$4 sm:$0xff]  }
  0x2b   : > { %1470 = vmatprep.mubr.msk.bf16.mxu0 %vm487_vm2, %v1569_v9  ;;  %v1587_v9 = vld [vmem:[%s1697_s24 + $0x20] ss:$8 sps:$4 sm:$0xff]  }
  0x32   : > { %1471 = vmatmul.mubr.msk.bf16.gmra.mrb[12].mxu0 %vm487_vm2, %v1570_v10  ;;  %v1588_v10 = vld [vmem:[%s1697_s24 + $0x34] ss:$8 sps:$4 sm:$0xff]  }
  0x33   : > { %1474 = vmatprep.mubr.msk.bf16.mxu0 %vm487_vm2, %v1571_v11  ;;  %v1590_v11 = vld [vmem:[%s1697_s24 + $0x30] ss:$8 sps:$4 sm:$0xff]  }
  0x3a   : > { %1475 = vmatmul.mubr.msk.bf16.gmra.mrb[16].mxu0 %vm487_vm2, %v1572_v12  ;;  %v1591_v12 = vld [vmem:[%s1697_s24 + $0x44] ss:$8 sps:$4 sm:$0xff]  }
  0x3b   : > { %1478 = vmatprep.mubr.msk.bf16.mxu0 %vm487_vm2, %v1573_v13  ;;  %v1593_v13 = vld [vmem:[%s1697_s24 + $0x40] ss:$8 sps:$4 sm:$0xff]  }
  0x42   : > { %1479 = vmatmul.mubr.msk.bf16.gmra.mrb[20].mxu0 %vm487_vm2, %v1574_v14  ;;  %v1594_v14 = vld [vmem:[%s1697_s24 + $0x54] ss:$8 sps:$4 sm:$0xff]  }
  0x43   : > { %1482 = vmatprep.mubr.msk.bf16.mxu0 %vm487_vm2, %v1575_v15  ;;  %v1596_v15 = vld [vmem:[%s1697_s24 + $0x50] ss:$8 sps:$4 sm:$0xff]  }
  0x4a   : > { %1483 = vmatmul.mubr.msk.bf16.gmra.mrb[24].mxu0 %vm487_vm2, %v1576_v16  ;;  %v1597_v16 = vld [vmem:[%s1697_s24 + $0x64] ss:$8 sps:$4 sm:$0xff]  }
  0x4b   : > { %1486 = vmatprep.mubr.msk.bf16.mxu0 %vm487_vm2, %v1577_v17  ;;  %v1599_v17 = vld [vmem:[%s1697_s24 + $0x60] ss:$8 sps:$4 sm:$0xff]  }
  0x52   : > { %1487 = vmatmul.mubr.msk.bf16.gmra.mrb[28].mxu0 %vm487_vm2, %v1578_v18  ;;  %v1600_v18 = vld [vmem:[%s1697_s24 + $0x74] ss:$8 sps:$4 sm:$0xff]  }
  0xed   : > { %v1460_v21 = vpop.f32.mrb[0].mxu0 }
  0xee   : > { %v574_v22 = vpop.f32.mrb[1].mxu0 }
  0xef   : > { %v1461_v23 = vpop.f32.mrb[2].mxu0 }
  0xf0   : > { %v718_v24 = vpack.c.bf16 %v1461_v23, %v1460_v21  ;;  %v577_v25 = vpop.f32.mrb[3].mxu0 }
  0xf1   : > { %v717_v26 = vpack.c.bf16 %v577_v25, %v574_v22  ;;  %v1792_v22 = vld [vmem:[%s1852_s3] ss:$0 sm:$0xff] }
  0xf5   : > { %v1464_v27 = vpop.f32.mrb[4].mxu0 }
  0xf6   : > { %v590_v28 = vpop.f32.mrb[5].mxu0 }
  0xf7   : > { %v1465_v29 = vpop.f32.mrb[6].mxu0 }
  0xf8   : > { %v720_v30 = vpack.c.bf16 %v1465_v29, %v1464_v27  ;;  %v593_v31 = vpop.f32.mrb[7].mxu0 }
  0xf9   : > { %v719_v32 = vpack.c.bf16 %v593_v31, %v590_v28 }
  0xfd   : > { %v1468_v33 = vpop.f32.mrb[8].mxu0 }
  0xfe   : > { %v606_v34 = vpop.f32.mrb[9].mxu0 }
  0xff   : > { %v1469_v35 = vpop.f32.mrb[10].mxu0 }
 0x100   : > { %v722_v36 = vpack.c.bf16 %v1469_v35, %v1468_v33  ;;  %v609_v37 = vpop.f32.mrb[11].mxu0 }
 0x101   : > { %v721_v38 = vpack.c.bf16 %v609_v37, %v606_v34 }
 0x105   : > { %v1472_v39 = vpop.f32.mrb[12].mxu0 }
 0x106   : > { %v622_v40 = vpop.f32.mrb[13].mxu0 }
 0x107   : > { %v1473_v41 = vpop.f32.mrb[14].mxu0 }
 0x108   : > { %v724_v42 = vpack.c.bf16 %v1473_v41, %v1472_v39  ;;  %v625_v43 = vpop.f32.mrb[15].mxu0 }
 0x109   : > { %v723_v44 = vpack.c.bf16 %v625_v43, %v622_v40 }
 0x10d   : > { %v1476_v45 = vpop.f32.mrb[16].mxu0 }
 0x10e   : > { %v638_v46 = vpop.f32.mrb[17].mxu0 }
 0x10f   : > { %v1477_v47 = vpop.f32.mrb[18].mxu0 }
 0x110   : > { %v726_v48 = vpack.c.bf16 %v1477_v47, %v1476_v45  ;;  %v641_v49 = vpop.f32.mrb[19].mxu0 }
 0x111   : > { %v725_v50 = vpack.c.bf16 %v641_v49, %v638_v46 }
 0x113   : > { %1368 = vmatprep.subr.bf16.mxu1 %v725_v50 }
 0x114   : > { %1369 = vmatpush3.bf16.msra.mxu1 %v717_v26 }
 0x115   : > { %v1480_v51 = vpop.f32.mrb[20].mxu0  ;;  %1370 = vmatprep.subr.bf16.mxu1 %v726_v48 }
 0x116   : > { %v654_v52 = vpop.f32.mrb[21].mxu0 }
 0x117   : > { %v1481_v53 = vpop.f32.mrb[22].mxu0 }
 0x118   : > { %v728_v54 = vpack.c.bf16 %v1481_v53, %v1480_v51  ;;  %v657_v55 = vpop.f32.mrb[23].mxu0  ;;  %1371 = vmatpush3.bf16.msra.mxu1 %v718_v24 }
 0x119   : > { %v727_v56 = vpack.c.bf16 %v657_v55, %v654_v52 }
 0x11b   : > { %1372 = vmatprep.subr.bf16.mxu1 %v727_v56 }
 0x11c   : > { %1373 = vmatpush3.bf16.msra.mxu1 %v719_v32 }
 0x11d   : > { %v1484_v57 = vpop.f32.mrb[24].mxu0  ;;  %1374 = vmatprep.subr.bf16.mxu1 %v728_v54 }
 0x11e   : > { %v670_v58 = vpop.f32.mrb[25].mxu0 }
 0x11f   : > { %v1485_v59 = vpop.f32.mrb[26].mxu0 }
 0x120   : > { %v730_v60 = vpack.c.bf16 %v1485_v59, %v1484_v57  ;;  %v673_v61 = vpop.f32.mrb[27].mxu0  ;;  %1375 = vmatpush3.bf16.msra.mxu1 %v720_v30 }
 0x121   : > { %v729_v62 = vpack.c.bf16 %v673_v61, %v670_v58 }
 0x123   : > { %1376 = vmatprep.subr.bf16.mxu1 %v729_v62 }
 0x124   : > { %1377 = vmatpush3.bf16.msra.mxu1 %v721_v38 }
 0x125   : > { %v1488_v63 = vpop.f32.mrb[28].mxu0  ;;  %1378 = vmatprep.subr.bf16.mxu1 %v730_v60 }
 0x126   : > { %v686_v0 = vpop.f32.mrb[29].mxu0 }
 0x127   : > { %v1489_v1 = vpop.f32.mrb[30].mxu0 }
 0x128   : > { %v732_v2 = vpack.c.bf16 %v1489_v1, %v1488_v63  ;;  %v689_v3 = vpop.f32.mrb[31].mxu0  ;;  %1379 = vmatpush3.bf16.msra.mxu1 %v722_v36 }
 0x129   : > { %v731_v4 = vpack.c.bf16 %v689_v3, %v686_v0 }
 0x12b   : > { %1380 = vmatprep.subr.bf16.mxu1 %v731_v4 }
 0x12c   : > { %1381 = vmatpush3.bf16.msra.mxu1 %v723_v44 }
 0x12d   : > { %1382 = vmatprep.subr.bf16.mxu1 %v732_v2 }
 0x130   : > { %1383 = vmatpush3.bf16.msra.mxu1 %v724_v42 }
 0x133   : > { %853 = vmatmul.mubr.bf16.vlgmr.msra.gmra.mrb[0].mxu1 %v1579_v5 }
 0x134   : > { %860 = vmatprep.mubr.bf16.mxu1 %v1582_v6 }
 0x13b   : > { %861 = vmatmul.mubr.bf16.gmra.mrb[4].mxu1 %v1584_v7 }
 0x13c   : > { %868 = vmatprep.mubr.bf16.mxu1 %v1585_v8 }
 0x143   : > { %869 = vmatmul.mubr.bf16.gmra.mrb[8].mxu1 %v1587_v9 }
 0x144   : > { %876 = vmatprep.mubr.bf16.mxu1 %v1588_v10 }
 0x14b   : > { %877 = vmatmul.mubr.bf16.gmra.mrb[12].mxu1 %v1590_v11 }
 0x14c   : > { %884 = vmatprep.mubr.bf16.mxu1 %v1591_v12 }
 0x153   : > { %885 = vmatmul.mubr.bf16.gmra.mrb[16].mxu1 %v1593_v13 }
 0x154   : > { %892 = vmatprep.mubr.bf16.mxu1 %v1594_v14 }
 0x15b   : > { %893 = vmatmul.mubr.bf16.gmra.mrb[20].mxu1 %v1596_v15 }
 0x15c   : > { %900 = vmatprep.mubr.bf16.mxu1 %v1597_v16 }
 0x163   : > { %901 = vmatmul.mubr.bf16.gmra.mrb[24].mxu1 %v1599_v17 }
 0x164   : > { %908 = vmatprep.mubr.bf16.mxu1 %v1600_v18 }
 0x16b   : > { %909 = vmatmul.mubr.bf16.gmra.mrb[28].mxu1 %v1602_v19 }
 0x206   : > { %v1384_v21 = vpop.f32.mrb[0].mxu1 }
 0x207   : > { %v1385_v23 = vpop.f32.mrb[1].mxu1 }
 0x208   : > { %v1386_v24 = vadd.f32 %v1385_v23, %v1384_v21  ;;  %v1387_v25 = vpop.f32.mrb[2].mxu1 }
 0x209   : > { %v1388_v26 = vpop.f32.mrb[3].mxu1 }
 0x20a   : > { %v855_v27 = vadd.f32 %v1386_v24, %v1792_v22  ;;  %v1389_v28 = vadd.f32 %v1388_v26, %v1387_v25 }
 0x20c   : > { %v858_v29 = vadd.f32 %v1389_v28, %v1792_v22  ;;  %v917_v30 = vmax.f32 %v855_v27, 0.0 }
 0x20e   : > { %v918_v31 = vmax.f32 %v858_v29, 0.0  ;;  %v1390_v32 = vpop.f32.mrb[4].mxu1 }
 0x20f   : > { %v1391_v33 = vpop.f32.mrb[5].mxu1 }
 0x210   : > { %v933_v34 = vpack.c.bf16 %v918_v31, %v917_v30  ;;  %v1392_v35 = vadd.f32 %v1391_v33, %v1390_v32  ;;  %v1393_v36 = vpop.f32.mrb[6].mxu1 }
 0x211   : > { %v1394_v37 = vpop.f32.mrb[7].mxu1 }
 0x212   : > { %v863_v38 = vadd.f32 %v1392_v35, %v1792_v22  ;;  %v1395_v39 = vadd.f32 %v1394_v37, %v1393_v36  ;;  %1494 = vmatprep.mubr.msk.bf16.mxu0 %vm957_vm3, %v933_v34 }
 0x214   : > { %v866_v40 = vadd.f32 %v1395_v39, %v1792_v22  ;;  %v919_v41 = vmax.f32 %v863_v38, 0.0 }
 0x216   : > { %v920_v42 = vmax.f32 %v866_v40, 0.0  ;;  %v1396_v43 = vpop.f32.mrb[8].mxu1 }
 0x217   : > { %v1397_v44 = vpop.f32.mrb[9].mxu1 }
 0x218   : > { %v934_v45 = vpack.c.bf16 %v920_v42, %v919_v41  ;;  %v1398_v46 = vadd.f32 %v1397_v44, %v1396_v43  ;;  %v1399_v47 = vpop.f32.mrb[10].mxu1 }
 0x219   : > { %v1400_v48 = vpop.f32.mrb[11].mxu1 }
 0x21a   : > { %v871_v49 = vadd.f32 %v1398_v46, %v1792_v22  ;;  %v1401_v50 = vadd.f32 %v1400_v48, %v1399_v47  ;;  %1495 = vmatmul.mubr.msk.bf16.vlgmr.msra.gmra.mrb[32].mxu0 %vm957_vm3, %v934_v45  ;;  %v1615_v47 = vmov 0.0  }
 0x21b   : > { %1510 = vmatprep.subr.bf16.mxu1 %v1615_v47  ;;  %1526 = vmatprep.mubr.msk.bf16.mxu1 %vm1616_vm4, %v1615_v47 }
 0x21c   : > { %v874_v51 = vadd.f32 %v1401_v50, %v1792_v22  ;;  %v921_v52 = vmax.f32 %v871_v49, 0.0 }
 0x21e   : > { %v922_v53 = vmax.f32 %v874_v51, 0.0  ;;  %v1402_v54 = vpop.f32.mrb[12].mxu1 }
 0x21f   : > { %v1403_v55 = vpop.f32.mrb[13].mxu1 }
 0x220   : > { %v935_v56 = vpack.c.bf16 %v922_v53, %v921_v52  ;;  %v1404_v57 = vadd.f32 %v1403_v55, %v1402_v54  ;;  %v1405_v58 = vpop.f32.mrb[14].mxu1 }
 0x221   : > { %v1406_v59 = vpop.f32.mrb[15].mxu1 }
 0x222   : > { %v879_v60 = vadd.f32 %v1404_v57, %v1792_v22  ;;  %v1407_v61 = vadd.f32 %v1406_v59, %v1405_v58  ;;  %1498 = vmatprep.mubr.msk.bf16.mxu0 %vm957_vm3, %v935_v56 }
 0x224   : > { %v882_v62 = vadd.f32 %v1407_v61, %v1792_v22  ;;  %v923_v63 = vmax.f32 %v879_v60, 0.0 }
 0x226   : > { %v924_v0 = vmax.f32 %v882_v62, 0.0  ;;  %v1408_v1 = vpop.f32.mrb[16].mxu1 }
 0x227   : > { %v1409_v2 = vpop.f32.mrb[17].mxu1 }
 0x228   : > { %v936_v3 = vpack.c.bf16 %v924_v0, %v923_v63  ;;  %v1410_v4 = vadd.f32 %v1409_v2, %v1408_v1  ;;  %v1411_v5 = vpop.f32.mrb[18].mxu1 }
 0x229   : > { %v1412_v6 = vpop.f32.mrb[19].mxu1 }
 0x22a   : > { %v887_v7 = vadd.f32 %v1410_v4, %v1792_v22  ;;  %v1413_v8 = vadd.f32 %v1412_v6, %v1411_v5  ;;  %1499 = vmatmul.mubr.msk.bf16.gmra.mrb[36].mxu0 %vm957_vm3, %v936_v3 }
 0x22c   : > { %v890_v9 = vadd.f32 %v1413_v8, %v1792_v22  ;;  %v925_v10 = vmax.f32 %v887_v7, 0.0  ;;  %v1080_v7 = vld [vmem:[%s1692_s21] sm:$0xf] }
 0x22d   : > { %v1079_v8 = vld [vmem:[#allocation2] sm:$0xff] }
 0x22e   : > { %v926_v11 = vmax.f32 %v890_v9, 0.0  ;;  %v1414_v12 = vpop.f32.mrb[20].mxu1 }
 0x22f   : > { %v1415_v13 = vpop.f32.mrb[21].mxu1 }
 0x230   : > { %v937_v14 = vpack.c.bf16 %v926_v11, %v925_v10  ;;  %v1416_v15 = vadd.f32 %v1415_v13, %v1414_v12  ;;  %v1417_v16 = vpop.f32.mrb[22].mxu1 }
 0x231   : > { %v1418_v17 = vpop.f32.mrb[23].mxu1 }
 0x232   : > { %v895_v18 = vadd.f32 %v1416_v15, %v1792_v22  ;;  %v1419_v19 = vadd.f32 %v1418_v17, %v1417_v16  ;;  %1502 = vmatprep.mubr.msk.bf16.mxu0 %vm957_vm3, %v937_v14  ;;  %v1136_v14 = vld [vmem:[%s1856_s7] sm:$0xff] (!%p1344_p6)  ;;  %v1152_v16 = vld [vmem:[%s1857_s8 + $0x8] sm:$0xff] (!%p1344_p6)  ;;  %v1617_v17 = vmov (!%p1344_p6), 0  }
 0x233   : > { %v1151_v15 = vld [vmem:[%s1857_s8] sm:$0xff] (!%p1344_p6)  ;;  %1605 = vset.pattern.permute.xlu0 (!%p1344_p6), %v1617_v17 }
 0x234   : > { %v898_v20 = vadd.f32 %v1419_v19, %v1792_v22  ;;  %v927_v21 = vmax.f32 %v895_v18, 0.0  ;;  %v1618_v18 = vmov (!%p1344_p6), 0.0|0.0   ;;  %v1542_v19 = vpack.c.bf16 (!%p1344_p6), %v1152_v16, %v1151_v15  ;;  %1140 = vperm.xlu0 (!%p1344_p6), %1605, %v1136_v14  }
 0x235   : > { %1541 = vmatprep.subr.bf16.mxu0 (!%p1344_p6), %v1618_v18 }
 0x236   : > { %v928_v23 = vmax.f32 %v898_v20, 0.0  ;;  %v1420_v24 = vpop.f32.mrb[24].mxu1  ;;  %v1153_v20 = vld [vmem:[%s1857_s8 + $0x10] sm:$0xff] (!%p1344_p6)  ;;  %1543 = vmatpush3.bf16.msra.mxu0 (!%p1344_p6), %v1542_v19 }
 0x237   : > { %v1421_v25 = vpop.f32.mrb[25].mxu1  ;;  %1544 = vmatprep.subr.bf16.mxu0 (!%p1344_p6), %v1618_v18 }
 0x238   : > { %v938_v26 = vpack.c.bf16 %v928_v23, %v927_v21  ;;  %v1422_v27 = vadd.f32 %v1421_v25, %v1420_v24  ;;  %v1423_v28 = vpop.f32.mrb[26].mxu1  ;;  %v1154_v21 = vld [vmem:[%s1857_s8 + $0x18] sm:$0xff] (!%p1344_p6)  ;;  %v1620_v24 = vmov (!%p1344_p6), 0.0   ;;  %v1345_v25 = vld [vmem:[%s1854_s5] ss:$0 sm:$0xff] (!%p1344_p6) }
 0x239   : > { %v1424_v29 = vpop.f32.mrb[27].mxu1  ;;  %v1545_v23 = vpack.c.bf16 (!%p1344_p6), %v1154_v21, %v1153_v20 }
 0x23a   : > { %v903_v30 = vadd.f32 %v1422_v27, %v1792_v22  ;;  %v1425_v31 = vadd.f32 %v1424_v29, %v1423_v28  ;;  %1503 = vmatmul.mubr.msk.bf16.gmra.mrb[40].mxu0 %vm957_vm3, %v938_v26 }
 0x23b   : > { %1546 = vmatpush3.bf16.msra.mxu0 (!%p1344_p6), %v1545_v23 }
 0x23c   : > { %v906_v32 = vadd.f32 %v1425_v31, %v1792_v22  ;;  %v929_v33 = vmax.f32 %v903_v30, 0.0  ;;  %v1346_v30 = vld [vmem:[%s1858_s9] ss:$0 sm:$0xff] (!%p1344_p6) }
 0x23e   : > { %v930_v34 = vmax.f32 %v906_v32, 0.0  ;;  %v1426_v35 = vpop.f32.mrb[28].mxu1 }
 0x23f   : > { %v1427_v36 = vpop.f32.mrb[29].mxu1 }
 0x240   : > { %v939_v37 = vpack.c.bf16 %v930_v34, %v929_v33  ;;  %v1428_v38 = vadd.f32 %v1427_v36, %v1426_v35  ;;  %v1429_v39 = vpop.f32.mrb[30].mxu1 }
 0x241   : > { %v1430_v40 = vpop.f32.mrb[31].mxu1 }
 0x242   : > { %v911_v41 = vadd.f32 %v1428_v38, %v1792_v22  ;;  %v1431_v42 = vadd.f32 %v1430_v40, %v1429_v39  ;;  %1506 = vmatprep.mubr.msk.bf16.mxu0 %vm957_vm3, %v939_v37 }
 0x244   : > { %v914_v43 = vadd.f32 %v1431_v42, %v1792_v22  ;;  %v931_v44 = vmax.f32 %v911_v41, 0.0 }
 0x246   : > { %v932_v45 = vmax.f32 %v914_v43, 0.0 }
 0x248   : > { %v940_v46 = vpack.c.bf16 %v932_v45, %v931_v44 }
 0x24a   : > { %1507 = vmatmul.mubr.msk.bf16.gmra.mrb[44].mxu0 %vm957_vm3, %v940_v46 }
 0x24b   : > { %1538 = vmatprep.mubr.msk.f32.mxu0 (!%p1344_p6), %vm1619_vm5, %v1620_v24 }
 0x2b3   : > { %v1141_v26 = vpop.permute.xlu0 (!%p1344_p6), %1140 }
 0x2b4   : > { %v1149_v28 = vmul.f32 (!%p1344_p6), %v1345_v25, %v1141_v26 }
 0x2ed   : > { %v1496_v48 = vpop.f32.mrb[32].mxu0 }
 0x2ee   : > { %v1016_v49 = vpop.f32.mrb[33].mxu0 }
 0x2ef   : > { %v1497_v50 = vpop.f32.mrb[34].mxu0 }
 0x2f0   : > { %v1082_v51 = vpack.c.bf16 %v1497_v50, %v1496_v48  ;;  %v1019_v52 = vpop.f32.mrb[35].mxu0 }
 0x2f1   : > { %v1081_v53 = vpack.c.bf16 %v1019_v52, %v1016_v49 }
 0x2f3   : > { %1511 = vmatpush3.bf16.msra.mxu1 %v1081_v53 }
 0x2f4   : > { %1512 = vmatprep.subr.bf16.mxu1 %v1615_v47 }
 0x2f7   : > { %1513 = vmatpush3.bf16.msra.mxu1 %v1082_v51 }
 0x2f8   : > { %1514 = vmatprep.subr.bf16.mxu1 %v1615_v47 }
 0x2fd   : > { %v1500_v22 = vpop.f32.mrb[36].mxu0 }
 0x2fe   : > { %v1032_v54 = vpop.f32.mrb[37].mxu0 }
 0x2ff   : > { %v1501_v55 = vpop.f32.mrb[38].mxu0 }
 0x300   : > { %v1084_v56 = vpack.c.bf16 %v1501_v55, %v1500_v22  ;;  %v1035_v57 = vpop.f32.mrb[39].mxu0 }
 0x301   : > { %v1083_v58 = vpack.c.bf16 %v1035_v57, %v1032_v54 }
 0x303   : > { %1515 = vmatpush3.bf16.msra.mxu1 %v1083_v58 }
 0x304   : > { %1516 = vmatprep.subr.bf16.mxu1 %v1615_v47 }
 0x307   : > { %1517 = vmatpush3.bf16.msra.mxu1 %v1084_v56 }
 0x308   : > { %1518 = vmatprep.subr.bf16.mxu1 %v1615_v47 }
 0x30d   : > { %v1504_v59 = vpop.f32.mrb[40].mxu0 }
 0x30e   : > { %v1048_v60 = vpop.f32.mrb[41].mxu0 }
 0x30f   : > { %v1505_v61 = vpop.f32.mrb[42].mxu0 }
 0x310   : > { %v1086_v62 = vpack.c.bf16 %v1505_v61, %v1504_v59  ;;  %v1051_v63 = vpop.f32.mrb[43].mxu0 }
 0x311   : > { %v1085_v0 = vpack.c.bf16 %v1051_v63, %v1048_v60 }
 0x313   : > { %1519 = vmatpush3.bf16.msra.mxu1 %v1085_v0 }
 0x314   : > { %1520 = vmatprep.subr.bf16.mxu1 %v1615_v47 }
 0x317   : > { %1521 = vmatpush3.bf16.msra.mxu1 %v1086_v62 }
 0x318   : > { %1522 = vmatprep.subr.bf16.mxu1 %v1615_v47 }
 0x31d   : > { %v1508_v1 = vpop.f32.mrb[44].mxu0 }
 0x31e   : > { %v1064_v2 = vpop.f32.mrb[45].mxu0 }
 0x31f   : > { %v1509_v3 = vpop.f32.mrb[46].mxu0 }
 0x320   : > { %v1088_v4 = vpack.c.bf16 %v1509_v3, %v1508_v1  ;;  %v1067_v5 = vpop.f32.mrb[47].mxu0 }
 0x321   : > { %v1087_v6 = vpack.c.bf16 %v1067_v5, %v1064_v2 }
 0x323   : > { %1523 = vmatpush3.bf16.msra.mxu1 %v1087_v6 }
 0x324   : > { %1524 = vmatprep.subr.bf16.mxu1 %v1615_v47 }
 0x327   : > { %1525 = vmatpush3.bf16.msra.mxu1 %v1088_v4 }
 0x32a   : > { %1527 = vmatmul.mubr.bf16.vlgmr.msra.gmra.mrb[32].mxu1 %v1080_v7 }
 0x3fa   : > { %1134 = sbr.rel (%p1344_p6) target bundleno = 1249 (0x4e1), region = 68 }
 0x3fd   : > { %v1123_v9 = vpop.f32.mrb[32].mxu1 }
 0x3fe   : > { %v1129_v10 = vadd.f32 %v1123_v9, %v1079_v8  ;;  %v1528_v11 = vpop.f32.mrb[33].mxu1 }
 0x3ff   : > { %v1126_v12 = vpop.f32.mrb[34].mxu1 }
 0x400   : > { %1130 = vst.msk [vmem:[#allocation2] sm:$0xff] %vm957_vm3, %v1129_v10  ;;  %v1529_v13 = vpop.f32.mrb[35].mxu1 }
 0x407   : > { %v1135_v27 = vld [vmem:[#allocation2] sm:$0xff] }
 0x408   : > { %v1150_v29 = vadd.f32 %v1149_v28, %v1135_v27 }
 0x40a   : > { %1539 = vmatmul.mubr.msk.f32.vlgmr.msra.gmra.mrb[0].mxu0 %vm957_vm3, %v1150_v29 }
 0x4dd   : > { %v1231_v31 = vpop.f32.mrb[0].mxu0 }
 0x4de   : > { %v1232_v32 = vadd.f32 %v1346_v30, %v1231_v31  ;;  %v1540_v33 = vpop.f32.mrb[1].mxu0 }
 0x4e0   : > { %1235 = vst [vmem:[%s1859_s10] sm:$0xff] %v1232_v32 }
 0x4e1 PF: > { %s20_s13 = sadd.s32 1, %s1612_s13  }
 0x4e2   : > { %p17_p7 = scmp.ge.s32.totalorder %s20_s13, 4  }
 0x4e4   :  { %19 = sbr.rel (!%p17_p7) target bundleno = 1 (0x1), region = 97 }

</bundles_post_ra>
